<compile_context>
chip_gen: v5e
topology: v5e:2x2
jax: 0.10.0
libtpu: 0.0.40
codegen_flags: <defaults>
</compile_context>

<pallas_src>
import jax
import jax.numpy as jnp
from jax import lax
from jax.experimental import pallas as pl
from jax.experimental.pallas import tpu as pltpu

LEAK = 0.2      # LeakyReLU negative slope
BN_EPS = 1e-5   # torch BatchNorm2d default eps

# On v5e/v6e the MXU is bf16-native: flipping this to jnp.bfloat16 halves LHS
# DMA bytes and speeds up the matmul (accumulation stays f32 via
# preferred_element_type).  Kept at f32 for exact eval-mode parity.
MATMUL_DTYPE = jnp.float32


# ----------------------------- Pallas kernel -------------------------------

def _conv_mm_bias_lrelu_kernel(x_ref, w_ref, b_ref, o_ref):
    # fused: im2col-matmul -> (folded-BN) bias add -> LeakyReLU(0.2)
    acc = jnp.dot(x_ref[...], w_ref[...], preferred_element_type=jnp.float32)
    y = acc + b_ref[...]
    o_ref[...] = jnp.where(y > 0, y, LEAK * y)


def _pick_tile_m(m, max_tm=256):
    """Largest multiple-of-8 divisor of m that is <= max_tm (or m itself)."""
    if m <= max_tm:
        return m
    for tm in range(max_tm - (max_tm % 8), 7, -8):
        if m % tm == 0:
            return tm
    return m


def fused_matmul_bias_lrelu(x, w, b, *, max_tm=256):
    """(M, K) @ (K, C) + bias + LeakyReLU(0.2), tiled over M."""
    m, k = x.shape
    c = w.shape[1]
    tm = _pick_tile_m(m, max_tm)
    return pl.pallas_call(
        _conv_mm_bias_lrelu_kernel,
        out_shape=jax.ShapeDtypeStruct((m, c), jnp.float32),
        grid=(m // tm,),
        in_specs=[
            pl.BlockSpec((tm, k), lambda i: (i, 0)),
            pl.BlockSpec((k, c), lambda i: (0, 0)),
            pl.BlockSpec((1, c), lambda i: (0, 0)),
        ],
        out_specs=pl.BlockSpec((tm, c), lambda i: (i, 0)),
        compiler_params=pltpu.CompilerParams(
            dimension_semantics=("parallel",)),
    )(x.astype(MATMUL_DTYPE), w.astype(MATMUL_DTYPE), b)


# ------------------------------ conv layer ----------------------------------

def conv_bn_lrelu_nhwc(x, w_folded, bias):
    """Conv2d(k=4, s=2, p=1) + folded BatchNorm(eval) + LeakyReLU, NHWC in/out."""
    n, h, w, cin = x.shape
    ho, wo = h // 2, w // 2
    xp = jnp.pad(x, ((0, 0), (1, 1), (1, 1), (0, 0)))
    # im2col with (ky, kx, cin)-major patch flattening (matches folded weights).
    taps = [xp[:, ky:ky + 2 * ho:2, kx:kx + 2 * wo:2, :]
            for ky in range(4) for kx in range(4)]
    patches = jnp.stack(taps, axis=3).reshape(n * ho * wo, 16 * cin)
    out = fused_matmul_bias_lrelu(patches, w_folded, bias)
    return out.reshape(n, ho, wo, -1)       # stays NHWC for the next layer


# --------------------------- parameter handling -----------------------------

def _layer_channel_specs(shape, mid_channels, output_dim):
    """Mirror FeatureExtractor.__init__ layer construction."""
    min_fm = 4
    assert output_dim % (min_fm ** 2) == 0, 'output dim=%d' % output_dim
    in_channels = shape[0]
    size = int(shape[2]) // 2
    channels = mid_channels
    specs = [(in_channels, channels)]
    while size > min_fm:
        in_channels = channels
        if size == min_fm * 2:
            channels = output_dim // (min_fm ** 2)
        else:
            channels *= 2
        assert size % 2 == 0
        size //= 2
        specs.append((in_channels, channels))
    return specs


def init_feature_extractor(key, shape, mid_channels, output_dim):
    """Random conv weights + fresh BatchNorm (eval) folded for the Pallas path.

    folded[i] = (w2, bias): w2 is the conv weight reordered to
      (kh, kw, cin)-major (matching the NHWC patch flattening) and
      pre-multiplied per output channel by the BN scale; bias is
      beta + scale * (conv_bias - running_mean), shape (1, Cout).
    raw keeps torch-layout params for the XLA reference check.
    """
    specs = _layer_channel_specs(shape, mid_channels, output_dim)
    folded, raw = [], []
    for cin, cout in specs:
        key, k_w, k_b = jax.random.split(key, 3)
        w = 0.05 * jax.random.normal(k_w, (cout, cin, 4, 4), jnp.float32)
        b = 0.05 * jax.random.normal(k_b, (cout,), jnp.float32)
        gamma = jnp.ones((cout,), jnp.float32)   # BatchNorm fresh init, eval
        beta = jnp.zeros((cout,), jnp.float32)
        mean = jnp.zeros((cout,), jnp.float32)
        var = jnp.ones((cout,), jnp.float32)
        scale = gamma / jnp.sqrt(var + BN_EPS)
        w2 = (jnp.transpose(w, (2, 3, 1, 0)).reshape(16 * cin, cout)
              * scale[None, :])
        bias = (beta + scale * (b - mean)).reshape(1, cout)
        folded.append((w2, bias))
        raw.append((w, b, scale, beta, mean))
    return folded, raw, key


# ------------------------------- forward ------------------------------------

def feature_extractor_forward(folded_layers, x_nchw, output_dim):
    """FeatureExtractor.forward (eval mode): NCHW image -> (N, output_dim)."""
    x = jnp.transpose(x_nchw, (0, 2, 3, 1))       # NCHW -> NHWC, once
    for w2, bias in folded_layers:
        x = conv_bn_lrelu_nhwc(x, w2, bias)
    # torch.reshape(x, [-1, output_dim]) flattens the NCHW tensor in (C, H, W)
    # order -> single tiny transpose of the (N, 4, 4, C) feature map.
    x = jnp.transpose(x, (0, 3, 1, 2)).reshape(-1, output_dim)
    # Dropout(p): identity in eval mode.
    # TODO(synk): train-mode dropout mask / batch-stat BatchNorm not implemented.
    return x


def _reference_forward(raw_layers, x_nchw, output_dim):
    """Pure-XLA f32 reference of the same eval-mode forward."""
    x = x_nchw
    for w, b, scale, beta, mean in raw_layers:
        y = lax.conv_general_dilated(
            x, w, window_strides=(2, 2), padding=((1, 1), (1, 1)),
            dimension_numbers=("NCHW", "OIHW", "NCHW"),
            precision=lax.Precision.HIGHEST)
        y = y + b[None, :, None, None]
        y = ((y - mean[None, :, None, None]) * scale[None, :, None, None]
             + beta[None, :, None, None])
        x = jnp.where(y > 0, y, LEAK * y)
    return x.reshape(-1, output_dim)


# --------------------------------- main --------------------------------------

if __name__ == "__main__":
    # Small config: FeatureExtractor(shape=(4, 32, 32), mid_channels=8,
    # output_dim=2048) -> conv chain 4 -> 8 -> 16 -> 128 channels,
    # spatial 32 -> 16 -> 8 -> 4, final features (N, 2048).
    SHAPE = (4, 32, 32)
    MID_CHANNELS = 8
    OUTPUT_DIM = 2048
    N = 2

    key = jax.random.PRNGKey(0)
    folded, raw, key = init_feature_extractor(key, SHAPE, MID_CHANNELS, OUTPUT_DIM)
    key, kx = jax.random.split(key)
    x = jax.random.normal(kx, (N,) + SHAPE, jnp.float32)

    fwd = jax.jit(lambda p, xx: feature_extractor_forward(p, xx, OUTPUT_DIM))
    feats = fwd(folded, x)
    jax.block_until_ready(feats)

    assert feats.shape == (N, OUTPUT_DIM)
    assert bool(jnp.all(jnp.isfinite(feats)))

    ref = _reference_forward(raw, x, OUTPUT_DIM)
    max_err = float(jnp.max(jnp.abs(feats - ref)))
    assert jnp.allclose(feats, ref, atol=2e-3, rtol=2e-3), max_err

    print("KERNEL_OK")
</pallas_src>

<mosaic_0001>
module attributes {stable_mosaic.version = 11 : i64} {
  func.func @_conv_mm_bias_lrelu_kernel(%arg0: i32, %arg1: memref<256x64xf32, #tpu.memory_space<vmem>>, %arg2: memref<64x8xf32, #tpu.memory_space<vmem>>, %arg3: memref<1x8xf32, #tpu.memory_space<vmem>>, %arg4: memref<256x8xf32, #tpu.memory_space<vmem>>) attributes {dimension_semantics = [#tpu.dimension_semantics<parallel>], iteration_bounds = array<i64: 2>, scalar_prefetch = 0 : i64, scratch_operands = 0 : i64, tpu.core_type = #tpu.core_type<tc>, window_params = [{transform_indices = @transform_0, window_bounds = array<i64: 256, 64>}, {pipeline_mode = #tpu.pipeline_mode<synchronous>, transform_indices = @transform_1, window_bounds = array<i64: 64, 8>}, {pipeline_mode = #tpu.pipeline_mode<synchronous>, transform_indices = @transform_2, window_bounds = array<i64: 1, 8>}, {transform_indices = @transform_3, window_bounds = array<i64: 256, 8>}]} {
    %c0 = arith.constant 0 : index
    %c0_0 = arith.constant 0 : index
    %0 = vector.load %arg1[%c0, %c0_0] : memref<256x64xf32, #tpu.memory_space<vmem>>, vector<256x64xf32>
    %c0_1 = arith.constant 0 : index
    %c0_2 = arith.constant 0 : index
    %1 = vector.load %arg2[%c0_1, %c0_2] : memref<64x8xf32, #tpu.memory_space<vmem>>, vector<64x8xf32>
    %cst = arith.constant dense<0.000000e+00> : vector<256x8xf32>
    %2 = tpu.matmul %0, %1, %cst {dimension_numbers = #tpu.dot_dimension_numbers<[1], [0], [0], [1], [0, 0, 1, 1], [], []>} : vector<256x64xf32>, vector<64x8xf32>, vector<256x8xf32> -> vector<256x8xf32>
    %c0_3 = arith.constant 0 : index
    %c0_4 = arith.constant 0 : index
    %3 = vector.load %arg3[%c0_3, %c0_4] : memref<1x8xf32, #tpu.memory_space<vmem>>, vector<1x8xf32>
    %4 = vector.broadcast %3 : vector<1x8xf32> to vector<256x8xf32>
    %5 = arith.addf %2, %4 : vector<256x8xf32>
    %cst_5 = arith.constant 0.000000e+00 : f32
    %6 = vector.broadcast %cst_5 : f32 to vector<256x8xf32>
    %7 = arith.cmpf ogt, %5, %6 : vector<256x8xf32>
    %cst_6 = arith.constant 2.000000e-01 : f32
    %8 = vector.broadcast %cst_6 : f32 to vector<256x8xf32>
    %9 = arith.mulf %8, %5 : vector<256x8xf32>
    %10 = arith.select %7, %5, %9 : vector<256x8xi1>, vector<256x8xf32>
    %c0_7 = arith.constant 0 : index
    %c0_8 = arith.constant 0 : index
    %11 = vector.load %arg4[%c0_7, %c0_8] : memref<256x8xf32, #tpu.memory_space<vmem>>, vector<256x8xf32>
    tpu.vector_store %arg4[%c0_7, %c0_8], %10 {strides = array<i32>} : memref<256x8xf32, #tpu.memory_space<vmem>>, vector<256x8xf32>,
    return
  }
  func.func @transform_0(%arg0: i32) -> (i32, i32) {
    %c0_i32 = arith.constant 0 : i32
    %c0_i32_0 = arith.constant 0 : i32
    return %arg0, %c0_i32 : i32, i32
  }
  func.func @transform_1(%arg0: i32) -> (i32, i32) {
    %c0_i32 = arith.constant 0 : i32
    %c0_i32_0 = arith.constant 0 : i32
    %c0_i32_1 = arith.constant 0 : i32
    return %c0_i32, %c0_i32_0 : i32, i32
  }
  func.func @transform_2(%arg0: i32) -> (i32, i32) {
    %c0_i32 = arith.constant 0 : i32
    %c0_i32_0 = arith.constant 0 : i32
    %c0_i32_1 = arith.constant 0 : i32
    return %c0_i32, %c0_i32_0 : i32, i32
  }
  func.func @transform_3(%arg0: i32) -> (i32, i32) {
    %c0_i32 = arith.constant 0 : i32
    %c0_i32_0 = arith.constant 0 : i32
    return %arg0, %c0_i32 : i32, i32
  }
}

module attributes {stable_mosaic.version = 11 : i64} {
  func.func @_conv_mm_bias_lrelu_kernel(%arg0: i32, %arg1: memref<128x128xf32, #tpu.memory_space<vmem>>, %arg2: memref<128x16xf32, #tpu.memory_space<vmem>>, %arg3: memref<1x16xf32, #tpu.memory_space<vmem>>, %arg4: memref<128x16xf32, #tpu.memory_space<vmem>>) attributes {dimension_semantics = [#tpu.dimension_semantics<parallel>], iteration_bounds = array<i64: 1>, scalar_prefetch = 0 : i64, scratch_operands = 0 : i64, tpu.core_type = #tpu.core_type<tc>, window_params = [{transform_indices = @transform_0, window_bounds = array<i64: 128, 128>}, {pipeline_mode = #tpu.pipeline_mode<synchronous>, transform_indices = @transform_1, window_bounds = array<i64: 128, 16>}, {pipeline_mode = #tpu.pipeline_mode<synchronous>, transform_indices = @transform_2, window_bounds = array<i64: 1, 16>}, {transform_indices = @transform_3, window_bounds = array<i64: 128, 16>}]} {
    %c0 = arith.constant 0 : index
    %c0_0 = arith.constant 0 : index
    %0 = vector.load %arg1[%c0, %c0_0] : memref<128x128xf32, #tpu.memory_space<vmem>>, vector<128x128xf32>
    %c0_1 = arith.constant 0 : index
    %c0_2 = arith.constant 0 : index
    %1 = vector.load %arg2[%c0_1, %c0_2] : memref<128x16xf32, #tpu.memory_space<vmem>>, vector<128x16xf32>
    %cst = arith.constant dense<0.000000e+00> : vector<128x16xf32>
    %2 = tpu.matmul %0, %1, %cst {dimension_numbers = #tpu.dot_dimension_numbers<[1], [0], [0], [1], [0, 0, 1, 1], [], []>} : vector<128x128xf32>, vector<128x16xf32>, vector<128x16xf32> -> vector<128x16xf32>
    %c0_3 = arith.constant 0 : index
    %c0_4 = arith.constant 0 : index
    %3 = vector.load %arg3[%c0_3, %c0_4] : memref<1x16xf32, #tpu.memory_space<vmem>>, vector<1x16xf32>
    %4 = vector.broadcast %3 : vector<1x16xf32> to vector<128x16xf32>
    %5 = arith.addf %2, %4 : vector<128x16xf32>
    %cst_5 = arith.constant 0.000000e+00 : f32
    %6 = vector.broadcast %cst_5 : f32 to vector<128x16xf32>
    %7 = arith.cmpf ogt, %5, %6 : vector<128x16xf32>
    %cst_6 = arith.constant 2.000000e-01 : f32
    %8 = vector.broadcast %cst_6 : f32 to vector<128x16xf32>
    %9 = arith.mulf %8, %5 : vector<128x16xf32>
    %10 = arith.select %7, %5, %9 : vector<128x16xi1>, vector<128x16xf32>
    %c0_7 = arith.constant 0 : index
    %c0_8 = arith.constant 0 : index
    %11 = vector.load %arg4[%c0_7, %c0_8] : memref<128x16xf32, #tpu.memory_space<vmem>>, vector<128x16xf32>
    tpu.vector_store %arg4[%c0_7, %c0_8], %10 {strides = array<i32>} : memref<128x16xf32, #tpu.memory_space<vmem>>, vector<128x16xf32>,
    return
  }
  func.func @transform_0(%arg0: i32) -> (i32, i32) {
    %c0_i32 = arith.constant 0 : i32
    %c0_i32_0 = arith.constant 0 : i32
    return %arg0, %c0_i32 : i32, i32
  }
  func.func @transform_1(%arg0: i32) -> (i32, i32) {
    %c0_i32 = arith.constant 0 : i32
    %c0_i32_0 = arith.constant 0 : i32
    %c0_i32_1 = arith.constant 0 : i32
    return %c0_i32, %c0_i32_0 : i32, i32
  }
  func.func @transform_2(%arg0: i32) -> (i32, i32) {
    %c0_i32 = arith.constant 0 : i32
    %c0_i32_0 = arith.constant 0 : i32
    %c0_i32_1 = arith.constant 0 : i32
    return %c0_i32, %c0_i32_0 : i32, i32
  }
  func.func @transform_3(%arg0: i32) -> (i32, i32) {
    %c0_i32 = arith.constant 0 : i32
    %c0_i32_0 = arith.constant 0 : i32
    return %arg0, %c0_i32 : i32, i32
  }
}

module attributes {stable_mosaic.version = 11 : i64} {
  func.func @_conv_mm_bias_lrelu_kernel(%arg0: i32, %arg1: memref<32x256xf32, #tpu.memory_space<vmem>>, %arg2: memref<256x128xf32, #tpu.memory_space<vmem>>, %arg3: memref<1x128xf32, #tpu.memory_space<vmem>>, %arg4: memref<32x128xf32, #tpu.memory_space<vmem>>) attributes {dimension_semantics = [#tpu.dimension_semantics<parallel>], iteration_bounds = array<i64: 1>, scalar_prefetch = 0 : i64, scratch_operands = 0 : i64, tpu.core_type = #tpu.core_type<tc>, window_params = [{transform_indices = @transform_0, window_bounds = array<i64: 32, 256>}, {pipeline_mode = #tpu.pipeline_mode<synchronous>, transform_indices = @transform_1, window_bounds = array<i64: 256, 128>}, {pipeline_mode = #tpu.pipeline_mode<synchronous>, transform_indices = @transform_2, window_bounds = array<i64: 1, 128>}, {transform_indices = @transform_3, window_bounds = array<i64: 32, 128>}]} {
    %c0 = arith.constant 0 : index
    %c0_0 = arith.constant 0 : index
    %0 = vector.load %arg1[%c0, %c0_0] : memref<32x256xf32, #tpu.memory_space<vmem>>, vector<32x256xf32>
    %c0_1 = arith.constant 0 : index
    %c0_2 = arith.constant 0 : index
    %1 = vector.load %arg2[%c0_1, %c0_2] : memref<256x128xf32, #tpu.memory_space<vmem>>, vector<256x128xf32>
    %cst = arith.constant dense<0.000000e+00> : vector<32x128xf32>
    %2 = tpu.matmul %0, %1, %cst {dimension_numbers = #tpu.dot_dimension_numbers<[1], [0], [0], [1], [0, 0, 1, 1], [], []>} : vector<32x256xf32>, vector<256x128xf32>, vector<32x128xf32> -> vector<32x128xf32>
    %c0_3 = arith.constant 0 : index
    %c0_4 = arith.constant 0 : index
    %3 = vector.load %arg3[%c0_3, %c0_4] : memref<1x128xf32, #tpu.memory_space<vmem>>, vector<1x128xf32>
    %4 = vector.broadcast %3 : vector<1x128xf32> to vector<32x128xf32>
    %5 = arith.addf %2, %4 : vector<32x128xf32>
    %cst_5 = arith.constant 0.000000e+00 : f32
    %6 = vector.broadcast %cst_5 : f32 to vector<32x128xf32>
    %7 = arith.cmpf ogt, %5, %6 : vector<32x128xf32>
    %cst_6 = arith.constant 2.000000e-01 : f32
    %8 = vector.broadcast %cst_6 : f32 to vector<32x128xf32>
    %9 = arith.mulf %8, %5 : vector<32x128xf32>
    %10 = arith.select %7, %5, %9 : vector<32x128xi1>, vector<32x128xf32>
    %c0_7 = arith.constant 0 : index
    %c0_8 = arith.constant 0 : index
    %11 = vector.load %arg4[%c0_7, %c0_8] : memref<32x128xf32, #tpu.memory_space<vmem>>, vector<32x128xf32>
    tpu.vector_store %arg4[%c0_7, %c0_8], %10 {strides = array<i32>} : memref<32x128xf32, #tpu.memory_space<vmem>>, vector<32x128xf32>,
    return
  }
  func.func @transform_0(%arg0: i32) -> (i32, i32) {
    %c0_i32 = arith.constant 0 : i32
    %c0_i32_0 = arith.constant 0 : i32
    return %arg0, %c0_i32 : i32, i32
  }
  func.func @transform_1(%arg0: i32) -> (i32, i32) {
    %c0_i32 = arith.constant 0 : i32
    %c0_i32_0 = arith.constant 0 : i32
    %c0_i32_1 = arith.constant 0 : i32
    return %c0_i32, %c0_i32_0 : i32, i32
  }
  func.func @transform_2(%arg0: i32) -> (i32, i32) {
    %c0_i32 = arith.constant 0 : i32
    %c0_i32_0 = arith.constant 0 : i32
    %c0_i32_1 = arith.constant 0 : i32
    return %c0_i32, %c0_i32_0 : i32, i32
  }
  func.func @transform_3(%arg0: i32) -> (i32, i32) {
    %c0_i32 = arith.constant 0 : i32
    %c0_i32_0 = arith.constant 0 : i32
    return %arg0, %c0_i32 : i32, i32
  }
}

</mosaic_0001>

<bundles_post_ra>
// kernel: _lambda_.3
= control target key start
LH: loop header
LB: loop body
LE: loop exit
PB: predicated region body
PF: predicated region fallthrough
CT: control target
= control target key end

     0   :  { %s717_s12 = smov 0   ;;  %s934_s0 = inlined_call_operand.vmem [shape: f32[512,64], index: 0, kind: input, shape index: {}]   ;;  %s935_s1 = inlined_call_operand.vmem [shape: f32[64,8], index: 1, kind: input, shape index: {}]   ;;  %s936_s2 = inlined_call_operand.vmem [shape: f32[1,8], index: 2, kind: input, shape index: {}]   ;;  %s937_s3 = inlined_call_operand.vmem [shape: f32[512,8], index: 3, kind: output, shape index: {}]  }
   0x1 LB: > { %s613_s13 = sadd.s32 4294967295, %s695_s12   ;;  %p617_p0 = scmp.ge.s32.totalorder %s695_s12, 1  ;;  %s695_s12 = sphi %s717_s12, %s13_s12  }
   0x2   : > { %p138_p1 = scmp.lt.s32.totalorder %s695_s12, 3 }
   0x4   : > { %p139_p2 = pnand %p617_p0, %p138_p1 }
   0x5   : > { %s618_s18 = sshll.u32 (!%p139_p2), %s613_s13, 5 }
   0x6   : > { %142 = sbr.rel (%p139_p2) target bundleno = 222 (0xde), region = 32  ;;  %p163_p3 = scmp.lt.s32.totalorder (!%p139_p2), %s618_s18, 63 }
   0xb   : > { %v213_v0 = vld [vmem:[%s935_s1 + $0x38] sm:$0xff]  ;;  %v212_v1 = vld [vmem:[%s935_s1 + $0x30] sm:$0xff]  ;;  %v211_v2 = vld [vmem:[%s935_s1 + $0x28] sm:$0xff]  ;;  %s939_s18 = smov (!%p163_p3, %s618_s18), 63  ;;  %vm218_vm0 = vcmask 523264   ;;  %vm524_vm1 = vcmask 64512  }
   0xc   : > { %657 = vmatpush.msra.mxu2 %v213_v0  ;;  %658 = vmatpush.msra.mxu3 %v213_v0  ;;  %v210_v3 = vld [vmem:[%s935_s1 + $0x20] sm:$0xff]  ;;  %v209_v4 = vld [vmem:[%s935_s1 + $0x18] sm:$0xff]  ;;  %s619_s25 = sshll.u32 %s939_s18, 3  ;;  %v208_v5 = vld [vmem:[%s935_s1 + $0x10] sm:$0xff] }
   0xd   : > { %323 = vmatpush.msra.mxu0 %v213_v0  ;;  %656 = vmatpush.msra.mxu1 %v213_v0  ;;  %v207_v6 = vld [vmem:[%s935_s1 + $0x8] sm:$0xff]  ;;  %s754_s5 = scalar_lea.vmem %s934_s0, %s619_s25  ;;  %v206_v7 = vld [vmem:[%s935_s1] sm:$0xff]  ;;  %s835_s13 = scalar_lea.vmem %s937_s3, %s619_s25 }
   0xe   : > { %660 = vmatpush.msra.mxu2 %v212_v1  ;;  %661 = vmatpush.msra.mxu3 %v212_v1  ;;  %v190_v8 = vld [vmem:[%s754_s5 + $0x80] sm:$0xff]  ;;  %v191_v12 = vld [vmem:[%s754_s5 + $0x88] sm:$0xff]  ;;  %v192_v16 = vld [vmem:[%s754_s5 + $0x90] sm:$0xff] }
   0xf   : > { %324 = vmatpush.msra.mxu0 %v212_v1  ;;  %659 = vmatpush.msra.mxu1 %v212_v1  ;;  %v198_v9 = vld [vmem:[%s754_s5 + $0xc0] sm:$0xff]  ;;  %v199_v13 = vld [vmem:[%s754_s5 + $0xc8] sm:$0xff]  ;;  %v200_v17 = vld [vmem:[%s754_s5 + $0xd0] sm:$0xff] }
  0x10   : > { %663 = vmatpush.msra.mxu2 %v211_v2  ;;  %664 = vmatpush.msra.mxu3 %v211_v2  ;;  %v174_v10 = vld [vmem:[%s754_s5] sm:$0xff]  ;;  %v175_v14 = vld [vmem:[%s754_s5 + $0x8] sm:$0xff]  ;;  %v176_v18 = vld [vmem:[%s754_s5 + $0x10] sm:$0xff] }
  0x11   : > { %325 = vmatpush.msra.mxu0 %v211_v2  ;;  %662 = vmatpush.msra.mxu1 %v211_v2  ;;  %v182_v11 = vld [vmem:[%s754_s5 + $0x40] sm:$0xff]  ;;  %v183_v15 = vld [vmem:[%s754_s5 + $0x48] sm:$0xff]  ;;  %v184_v19 = vld [vmem:[%s754_s5 + $0x50] sm:$0xff] }
  0x12   : > { %666 = vmatpush.msra.mxu2 %v210_v3  ;;  %667 = vmatpush.msra.mxu3 %v210_v3  ;;  %v193_v20 = vld [vmem:[%s754_s5 + $0x98] sm:$0xff]  ;;  %v194_v24 = vld [vmem:[%s754_s5 + $0xa0] sm:$0xff]  ;;  %v195_v28 = vld [vmem:[%s754_s5 + $0xa8] sm:$0xff] }
  0x13   : > { %326 = vmatpush.msra.mxu0 %v210_v3  ;;  %665 = vmatpush.msra.mxu1 %v210_v3  ;;  %v201_v21 = vld [vmem:[%s754_s5 + $0xd8] sm:$0xff]  ;;  %v202_v25 = vld [vmem:[%s754_s5 + $0xe0] sm:$0xff]  ;;  %v203_v29 = vld [vmem:[%s754_s5 + $0xe8] sm:$0xff] }
  0x14   : > { %669 = vmatpush.msra.mxu2 %v209_v4  ;;  %670 = vmatpush.msra.mxu3 %v209_v4  ;;  %v177_v22 = vld [vmem:[%s754_s5 + $0x18] sm:$0xff]  ;;  %v178_v26 = vld [vmem:[%s754_s5 + $0x20] sm:$0xff]  ;;  %v179_v30 = vld [vmem:[%s754_s5 + $0x28] sm:$0xff] }
  0x15   : > { %327 = vmatpush.msra.mxu0 %v209_v4  ;;  %668 = vmatpush.msra.mxu1 %v209_v4  ;;  %v185_v23 = vld [vmem:[%s754_s5 + $0x58] sm:$0xff]  ;;  %v186_v27 = vld [vmem:[%s754_s5 + $0x60] sm:$0xff]  ;;  %v187_v31 = vld [vmem:[%s754_s5 + $0x68] sm:$0xff] }
  0x16   : > { %672 = vmatpush.msra.mxu2 %v208_v5  ;;  %673 = vmatpush.msra.mxu3 %v208_v5  ;;  %v196_v32 = vld [vmem:[%s754_s5 + $0xb0] sm:$0xff]  ;;  %v197_v36 = vld [vmem:[%s754_s5 + $0xb8] sm:$0xff]  ;;  %v826_v40 = vld [vmem:[%s936_s2] ss:$0 sm:$0xff] }
  0x17   : > { %328 = vmatpush.msra.mxu0 %v208_v5  ;;  %671 = vmatpush.msra.mxu1 %v208_v5  ;;  %v204_v33 = vld [vmem:[%s754_s5 + $0xf0] sm:$0xff]  ;;  %v205_v37 = vld [vmem:[%s754_s5 + $0xf8] sm:$0xff] }
  0x18   : > { %675 = vmatpush.msra.mxu2 %v207_v6  ;;  %676 = vmatpush.msra.mxu3 %v207_v6  ;;  %v180_v34 = vld [vmem:[%s754_s5 + $0x30] sm:$0xff]  ;;  %v181_v38 = vld [vmem:[%s754_s5 + $0x38] sm:$0xff] }
  0x19   : > { %329 = vmatpush.msra.mxu0 %v207_v6  ;;  %674 = vmatpush.msra.mxu1 %v207_v6  ;;  %v188_v35 = vld [vmem:[%s754_s5 + $0x70] sm:$0xff]  ;;  %v189_v39 = vld [vmem:[%s754_s5 + $0x78] sm:$0xff] }
  0x1a   : > { %678 = vmatpush.msra.mxu2 %v206_v7  ;;  %679 = vmatpush.msra.mxu3 %v206_v7 }
  0x1b   : > { %638 = vmatmul.msk.f32.vlgmr.msra.gmra.mxu2 %vm218_vm0, %v190_v8  ;;  %646 = vmatmul.msk.f32.vlgmr.msra.gmra.mxu3 %vm218_vm0, %v198_v9 }
  0x1c   : > { %330 = vmatpush.msra.mxu0 %v206_v7  ;;  %677 = vmatpush.msra.mxu1 %v206_v7 }
  0x1d   : > { %622 = vmatmul.msk.f32.vlgmr.msra.gmra.mxu0 %vm218_vm0, %v174_v10  ;;  %630 = vmatmul.msk.f32.vlgmr.msra.gmra.mxu1 %vm218_vm0, %v182_v11 }
  0x23   : > { %639 = vmatmul.msk.f32.gmra.mxu2 %vm218_vm0, %v191_v12  ;;  %647 = vmatmul.msk.f32.gmra.mxu3 %vm218_vm0, %v199_v13 }
  0x25   : > { %623 = vmatmul.msk.f32.gmra.mxu0 %vm218_vm0, %v175_v14  ;;  %631 = vmatmul.msk.f32.gmra.mxu1 %vm218_vm0, %v183_v15 }
  0x2b   : > { %640 = vmatmul.msk.f32.gmra.mxu2 %vm218_vm0, %v192_v16  ;;  %648 = vmatmul.msk.f32.gmra.mxu3 %vm218_vm0, %v200_v17 }
  0x2d   : > { %624 = vmatmul.msk.f32.gmra.mxu0 %vm218_vm0, %v176_v18  ;;  %632 = vmatmul.msk.f32.gmra.mxu1 %vm218_vm0, %v184_v19 }
  0x33   : > { %641 = vmatmul.msk.f32.gmra.mxu2 %vm218_vm0, %v193_v20  ;;  %649 = vmatmul.msk.f32.gmra.mxu3 %vm218_vm0, %v201_v21 }
  0x35   : > { %625 = vmatmul.msk.f32.gmra.mxu0 %vm218_vm0, %v177_v22  ;;  %633 = vmatmul.msk.f32.gmra.mxu1 %vm218_vm0, %v185_v23 }
  0x3b   : > { %642 = vmatmul.msk.f32.gmra.mxu2 %vm218_vm0, %v194_v24  ;;  %650 = vmatmul.msk.f32.gmra.mxu3 %vm218_vm0, %v202_v25 }
  0x3d   : > { %626 = vmatmul.msk.f32.gmra.mxu0 %vm218_vm0, %v178_v26  ;;  %634 = vmatmul.msk.f32.gmra.mxu1 %vm218_vm0, %v186_v27 }
  0x43   : > { %643 = vmatmul.msk.f32.gmra.mxu2 %vm218_vm0, %v195_v28  ;;  %651 = vmatmul.msk.f32.gmra.mxu3 %vm218_vm0, %v203_v29 }
  0x45   : > { %627 = vmatmul.msk.f32.gmra.mxu0 %vm218_vm0, %v179_v30  ;;  %635 = vmatmul.msk.f32.gmra.mxu1 %vm218_vm0, %v187_v31 }
  0x4b   : > { %644 = vmatmul.msk.f32.gmra.mxu2 %vm218_vm0, %v196_v32  ;;  %652 = vmatmul.msk.f32.gmra.mxu3 %vm218_vm0, %v204_v33 }
  0x4d   : > { %628 = vmatmul.msk.f32.gmra.mxu0 %vm218_vm0, %v180_v34  ;;  %636 = vmatmul.msk.f32.gmra.mxu1 %vm218_vm0, %v188_v35 }
  0x53   : > { %645 = vmatmul.msk.f32.gmra.mxu2 %vm218_vm0, %v197_v36  ;;  %653 = vmatmul.msk.f32.gmra.mxu3 %vm218_vm0, %v205_v37 }
  0x55   : > { %629 = vmatmul.msk.f32.gmra.mxu0 %vm218_vm0, %v181_v38  ;;  %637 = vmatmul.msk.f32.gmra.mxu1 %vm218_vm0, %v189_v39 }
  0x9a   : > { %v332_v41 = vpop.f32.mrf.mxu0  ;;  %v356_v42 = vpop.f32.mrf.mxu1 }
  0x9b   : > { %v333_v43 = vadd.f32 %v826_v40, %v332_v41  ;;  %v357_v44 = vadd.f32 %v826_v40, %v356_v42 }
  0x9d   : > { %vm428_vm2 = vcmp.gt.f32.partialorder %v333_v43, 0.0  ;;  %v460_v45 = vmul.f32 0.2, %v333_v43  ;;  %vm436_vm3 = vcmp.gt.f32.partialorder %v357_v44, 0.0  ;;  %v468_v46 = vmul.f32 0.2, %v357_v44 }
  0x9e   : > { %v380_v47 = vpop.f32.mrf.mxu2  ;;  %v404_v48 = vpop.f32.mrf.mxu3 }
  0x9f   : > { %v492_v49 = vsel %vm428_vm2, %v333_v43, %v460_v45  ;;  %v500_v50 = vsel %vm436_vm3, %v357_v44, %v468_v46  ;;  %v381_v51 = vadd.f32 %v826_v40, %v380_v47  ;;  %v405_v52 = vadd.f32 %v826_v40, %v404_v48 }
  0xa0   : > { %525 = vst.msk [vmem:[%s835_s13] sm:$0xff] %vm524_vm1, %v492_v49 }
  0xa1   : > { %533 = vst.msk [vmem:[%s835_s13 + $0x40] sm:$0xff] %vm524_vm1, %v500_v50  ;;  %vm444_vm4 = vcmp.gt.f32.partialorder %v381_v51, 0.0  ;;  %v476_v53 = vmul.f32 0.2, %v381_v51  ;;  %vm452_vm5 = vcmp.gt.f32.partialorder %v405_v52, 0.0 }
  0xa2   : > { %v484_v54 = vmul.f32 0.2, %v405_v52  ;;  %v335_v55 = vpop.f32.mrf.mxu0  ;;  %v359_v56 = vpop.f32.mrf.mxu1 }
  0xa3   : > { %v508_v57 = vsel %vm444_vm4, %v381_v51, %v476_v53  ;;  %v336_v58 = vadd.f32 %v826_v40, %v335_v55  ;;  %v360_v59 = vadd.f32 %v826_v40, %v359_v56 }
  0xa4   : > { %541 = vst.msk [vmem:[%s835_s13 + $0x80] sm:$0xff] %vm524_vm1, %v508_v57  ;;  %v516_v60 = vsel %vm452_vm5, %v405_v52, %v484_v54 }
  0xa5   : > { %549 = vst.msk [vmem:[%s835_s13 + $0xc0] sm:$0xff] %vm524_vm1, %v516_v60  ;;  %vm429_vm6 = vcmp.gt.f32.partialorder %v336_v58, 0.0  ;;  %v461_v61 = vmul.f32 0.2, %v336_v58  ;;  %vm437_vm7 = vcmp.gt.f32.partialorder %v360_v59, 0.0 }
  0xa6   : > { %v469_v62 = vmul.f32 0.2, %v360_v59  ;;  %v383_v63 = vpop.f32.mrf.mxu2  ;;  %v407_v0 = vpop.f32.mrf.mxu3 }
  0xa7   : > { %v493_v1 = vsel %vm429_vm6, %v336_v58, %v461_v61  ;;  %v384_v2 = vadd.f32 %v826_v40, %v383_v63  ;;  %v408_v3 = vadd.f32 %v826_v40, %v407_v0 }
  0xa8   : > { %526 = vst.msk [vmem:[%s835_s13 + $0x8] sm:$0xff] %vm524_vm1, %v493_v1  ;;  %v501_v4 = vsel %vm437_vm7, %v360_v59, %v469_v62 }
  0xa9   : > { %534 = vst.msk [vmem:[%s835_s13 + $0x48] sm:$0xff] %vm524_vm1, %v501_v4  ;;  %vm445_vm8 = vcmp.gt.f32.partialorder %v384_v2, 0.0  ;;  %v477_v5 = vmul.f32 0.2, %v384_v2  ;;  %vm453_vm9 = vcmp.gt.f32.partialorder %v408_v3, 0.0 }
  0xaa   : > { %v485_v6 = vmul.f32 0.2, %v408_v3  ;;  %v338_v7 = vpop.f32.mrf.mxu0  ;;  %v362_v8 = vpop.f32.mrf.mxu1 }
  0xab   : > { %v509_v9 = vsel %vm445_vm8, %v384_v2, %v477_v5  ;;  %v339_v10 = vadd.f32 %v826_v40, %v338_v7  ;;  %v363_v11 = vadd.f32 %v826_v40, %v362_v8 }
  0xac   : > { %542 = vst.msk [vmem:[%s835_s13 + $0x88] sm:$0xff] %vm524_vm1, %v509_v9  ;;  %v517_v12 = vsel %vm453_vm9, %v408_v3, %v485_v6 }
  0xad   : > { %550 = vst.msk [vmem:[%s835_s13 + $0xc8] sm:$0xff] %vm524_vm1, %v517_v12  ;;  %vm430_vm10 = vcmp.gt.f32.partialorder %v339_v10, 0.0  ;;  %v462_v13 = vmul.f32 0.2, %v339_v10  ;;  %vm438_vm11 = vcmp.gt.f32.partialorder %v363_v11, 0.0 }
  0xae   : > { %v470_v14 = vmul.f32 0.2, %v363_v11  ;;  %v386_v15 = vpop.f32.mrf.mxu2  ;;  %v410_v16 = vpop.f32.mrf.mxu3 }
  0xaf   : > { %v494_v17 = vsel %vm430_vm10, %v339_v10, %v462_v13  ;;  %v387_v18 = vadd.f32 %v826_v40, %v386_v15  ;;  %v411_v19 = vadd.f32 %v826_v40, %v410_v16 }
  0xb0   : > { %527 = vst.msk [vmem:[%s835_s13 + $0x10] sm:$0xff] %vm524_vm1, %v494_v17  ;;  %v502_v20 = vsel %vm438_vm11, %v363_v11, %v470_v14 }
  0xb1   : > { %535 = vst.msk [vmem:[%s835_s13 + $0x50] sm:$0xff] %vm524_vm1, %v502_v20  ;;  %vm446_vm12 = vcmp.gt.f32.partialorder %v387_v18, 0.0  ;;  %v478_v21 = vmul.f32 0.2, %v387_v18  ;;  %vm454_vm13 = vcmp.gt.f32.partialorder %v411_v19, 0.0 }
  0xb2   : > { %v486_v22 = vmul.f32 0.2, %v411_v19  ;;  %v341_v23 = vpop.f32.mrf.mxu0  ;;  %v365_v24 = vpop.f32.mrf.mxu1 }
  0xb3   : > { %v510_v25 = vsel %vm446_vm12, %v387_v18, %v478_v21  ;;  %v342_v26 = vadd.f32 %v826_v40, %v341_v23  ;;  %v366_v27 = vadd.f32 %v826_v40, %v365_v24 }
  0xb4   : > { %543 = vst.msk [vmem:[%s835_s13 + $0x90] sm:$0xff] %vm524_vm1, %v510_v25  ;;  %v518_v28 = vsel %vm454_vm13, %v411_v19, %v486_v22 }
  0xb5   : > { %551 = vst.msk [vmem:[%s835_s13 + $0xd0] sm:$0xff] %vm524_vm1, %v518_v28  ;;  %vm431_vm14 = vcmp.gt.f32.partialorder %v342_v26, 0.0  ;;  %v463_v29 = vmul.f32 0.2, %v342_v26  ;;  %vm439_vm15 = vcmp.gt.f32.partialorder %v366_v27, 0.0 }
  0xb6   : > { %v471_v30 = vmul.f32 0.2, %v366_v27  ;;  %v389_v31 = vpop.f32.mrf.mxu2  ;;  %v413_v32 = vpop.f32.mrf.mxu3 }
  0xb7   : > { %v495_v33 = vsel %vm431_vm14, %v342_v26, %v463_v29  ;;  %v390_v34 = vadd.f32 %v826_v40, %v389_v31  ;;  %v414_v35 = vadd.f32 %v826_v40, %v413_v32 }
  0xb8   : > { %528 = vst.msk [vmem:[%s835_s13 + $0x18] sm:$0xff] %vm524_vm1, %v495_v33  ;;  %v503_v36 = vsel %vm439_vm15, %v366_v27, %v471_v30 }
  0xb9   : > { %536 = vst.msk [vmem:[%s835_s13 + $0x58] sm:$0xff] %vm524_vm1, %v503_v36  ;;  %vm447_vm0 = vcmp.gt.f32.partialorder %v390_v34, 0.0  ;;  %v479_v37 = vmul.f32 0.2, %v390_v34  ;;  %vm455_vm2 = vcmp.gt.f32.partialorder %v414_v35, 0.0 }
  0xba   : > { %v487_v38 = vmul.f32 0.2, %v414_v35  ;;  %v344_v39 = vpop.f32.mrf.mxu0  ;;  %v368_v41 = vpop.f32.mrf.mxu1 }
  0xbb   : > { %v511_v42 = vsel %vm447_vm0, %v390_v34, %v479_v37  ;;  %v345_v43 = vadd.f32 %v826_v40, %v344_v39  ;;  %v369_v44 = vadd.f32 %v826_v40, %v368_v41 }
  0xbc   : > { %544 = vst.msk [vmem:[%s835_s13 + $0x98] sm:$0xff] %vm524_vm1, %v511_v42  ;;  %v519_v45 = vsel %vm455_vm2, %v414_v35, %v487_v38 }
  0xbd   : > { %552 = vst.msk [vmem:[%s835_s13 + $0xd8] sm:$0xff] %vm524_vm1, %v519_v45  ;;  %vm432_vm3 = vcmp.gt.f32.partialorder %v345_v43, 0.0  ;;  %v464_v46 = vmul.f32 0.2, %v345_v43  ;;  %vm440_vm4 = vcmp.gt.f32.partialorder %v369_v44, 0.0 }
  0xbe   : > { %v472_v47 = vmul.f32 0.2, %v369_v44  ;;  %v392_v48 = vpop.f32.mrf.mxu2  ;;  %v416_v49 = vpop.f32.mrf.mxu3 }
  0xbf   : > { %v496_v50 = vsel %vm432_vm3, %v345_v43, %v464_v46  ;;  %v393_v51 = vadd.f32 %v826_v40, %v392_v48  ;;  %v417_v52 = vadd.f32 %v826_v40, %v416_v49 }
  0xc0   : > { %529 = vst.msk [vmem:[%s835_s13 + $0x20] sm:$0xff] %vm524_vm1, %v496_v50  ;;  %v504_v53 = vsel %vm440_vm4, %v369_v44, %v472_v47 }
  0xc1   : > { %537 = vst.msk [vmem:[%s835_s13 + $0x60] sm:$0xff] %vm524_vm1, %v504_v53  ;;  %vm448_vm5 = vcmp.gt.f32.partialorder %v393_v51, 0.0  ;;  %v480_v54 = vmul.f32 0.2, %v393_v51  ;;  %vm456_vm6 = vcmp.gt.f32.partialorder %v417_v52, 0.0 }
  0xc2   : > { %v488_v55 = vmul.f32 0.2, %v417_v52  ;;  %v347_v56 = vpop.f32.mrf.mxu0  ;;  %v371_v57 = vpop.f32.mrf.mxu1 }
  0xc3   : > { %v512_v58 = vsel %vm448_vm5, %v393_v51, %v480_v54  ;;  %v348_v59 = vadd.f32 %v826_v40, %v347_v56  ;;  %v372_v60 = vadd.f32 %v826_v40, %v371_v57 }
  0xc4   : > { %545 = vst.msk [vmem:[%s835_s13 + $0xa0] sm:$0xff] %vm524_vm1, %v512_v58  ;;  %v520_v61 = vsel %vm456_vm6, %v417_v52, %v488_v55 }
  0xc5   : > { %553 = vst.msk [vmem:[%s835_s13 + $0xe0] sm:$0xff] %vm524_vm1, %v520_v61  ;;  %vm433_vm7 = vcmp.gt.f32.partialorder %v348_v59, 0.0  ;;  %v465_v62 = vmul.f32 0.2, %v348_v59  ;;  %vm441_vm8 = vcmp.gt.f32.partialorder %v372_v60, 0.0 }
  0xc6   : > { %v473_v63 = vmul.f32 0.2, %v372_v60  ;;  %v395_v0 = vpop.f32.mrf.mxu2  ;;  %v419_v1 = vpop.f32.mrf.mxu3 }
  0xc7   : > { %v497_v2 = vsel %vm433_vm7, %v348_v59, %v465_v62  ;;  %v396_v3 = vadd.f32 %v826_v40, %v395_v0  ;;  %v420_v4 = vadd.f32 %v826_v40, %v419_v1 }
  0xc8   : > { %530 = vst.msk [vmem:[%s835_s13 + $0x28] sm:$0xff] %vm524_vm1, %v497_v2  ;;  %v505_v5 = vsel %vm441_vm8, %v372_v60, %v473_v63 }
  0xc9   : > { %538 = vst.msk [vmem:[%s835_s13 + $0x68] sm:$0xff] %vm524_vm1, %v505_v5  ;;  %vm449_vm9 = vcmp.gt.f32.partialorder %v396_v3, 0.0  ;;  %v481_v6 = vmul.f32 0.2, %v396_v3  ;;  %vm457_vm10 = vcmp.gt.f32.partialorder %v420_v4, 0.0 }
  0xca   : > { %v489_v7 = vmul.f32 0.2, %v420_v4  ;;  %v350_v8 = vpop.f32.mrf.mxu0  ;;  %v374_v9 = vpop.f32.mrf.mxu1 }
  0xcb   : > { %v513_v10 = vsel %vm449_vm9, %v396_v3, %v481_v6  ;;  %v351_v11 = vadd.f32 %v826_v40, %v350_v8  ;;  %v375_v12 = vadd.f32 %v826_v40, %v374_v9 }
  0xcc   : > { %546 = vst.msk [vmem:[%s835_s13 + $0xa8] sm:$0xff] %vm524_vm1, %v513_v10  ;;  %v521_v13 = vsel %vm457_vm10, %v420_v4, %v489_v7 }
  0xcd   : > { %554 = vst.msk [vmem:[%s835_s13 + $0xe8] sm:$0xff] %vm524_vm1, %v521_v13  ;;  %vm434_vm11 = vcmp.gt.f32.partialorder %v351_v11, 0.0  ;;  %v466_v14 = vmul.f32 0.2, %v351_v11  ;;  %vm442_vm12 = vcmp.gt.f32.partialorder %v375_v12, 0.0 }
  0xce   : > { %v474_v15 = vmul.f32 0.2, %v375_v12  ;;  %v398_v16 = vpop.f32.mrf.mxu2  ;;  %v422_v17 = vpop.f32.mrf.mxu3 }
  0xcf   : > { %v498_v18 = vsel %vm434_vm11, %v351_v11, %v466_v14  ;;  %v399_v19 = vadd.f32 %v826_v40, %v398_v16  ;;  %v423_v20 = vadd.f32 %v826_v40, %v422_v17 }
  0xd0   : > { %531 = vst.msk [vmem:[%s835_s13 + $0x30] sm:$0xff] %vm524_vm1, %v498_v18  ;;  %v506_v21 = vsel %vm442_vm12, %v375_v12, %v474_v15 }
  0xd1   : > { %539 = vst.msk [vmem:[%s835_s13 + $0x70] sm:$0xff] %vm524_vm1, %v506_v21  ;;  %vm450_vm13 = vcmp.gt.f32.partialorder %v399_v19, 0.0  ;;  %v482_v22 = vmul.f32 0.2, %v399_v19  ;;  %vm458_vm14 = vcmp.gt.f32.partialorder %v423_v20, 0.0 }
  0xd2   : > { %v490_v23 = vmul.f32 0.2, %v423_v20  ;;  %v353_v24 = vpop.f32.mrf.mxu0  ;;  %v377_v25 = vpop.f32.mrf.mxu1 }
  0xd3   : > { %v514_v26 = vsel %vm450_vm13, %v399_v19, %v482_v22  ;;  %v354_v27 = vadd.f32 %v826_v40, %v353_v24  ;;  %v378_v28 = vadd.f32 %v826_v40, %v377_v25 }
  0xd4   : > { %547 = vst.msk [vmem:[%s835_s13 + $0xb0] sm:$0xff] %vm524_vm1, %v514_v26  ;;  %v522_v29 = vsel %vm458_vm14, %v423_v20, %v490_v23 }
  0xd5   : > { %555 = vst.msk [vmem:[%s835_s13 + $0xf0] sm:$0xff] %vm524_vm1, %v522_v29  ;;  %vm435_vm15 = vcmp.gt.f32.partialorder %v354_v27, 0.0  ;;  %v467_v30 = vmul.f32 0.2, %v354_v27  ;;  %vm443_vm0 = vcmp.gt.f32.partialorder %v378_v28, 0.0 }
  0xd6   : > { %v475_v31 = vmul.f32 0.2, %v378_v28  ;;  %v401_v32 = vpop.f32.mrf.mxu2  ;;  %v425_v33 = vpop.f32.mrf.mxu3 }
  0xd7   : > { %v499_v34 = vsel %vm435_vm15, %v354_v27, %v467_v30  ;;  %v402_v35 = vadd.f32 %v826_v40, %v401_v32  ;;  %v426_v36 = vadd.f32 %v826_v40, %v425_v33 }
  0xd8   : > { %532 = vst.msk [vmem:[%s835_s13 + $0x38] sm:$0xff] %vm524_vm1, %v499_v34  ;;  %v507_v37 = vsel %vm443_vm0, %v378_v28, %v475_v31 }
  0xd9   : > { %540 = vst.msk [vmem:[%s835_s13 + $0x78] sm:$0xff] %vm524_vm1, %v507_v37  ;;  %vm451_vm2 = vcmp.gt.f32.partialorder %v402_v35, 0.0  ;;  %v483_v38 = vmul.f32 0.2, %v402_v35  ;;  %vm459_vm3 = vcmp.gt.f32.partialorder %v426_v36, 0.0 }
  0xda   : > { %v491_v39 = vmul.f32 0.2, %v426_v36 }
  0xdb   : > { %v515_v41 = vsel %vm451_vm2, %v402_v35, %v483_v38 }
  0xdc   : > { %548 = vst.msk [vmem:[%s835_s13 + $0xb8] sm:$0xff] %vm524_vm1, %v515_v41  ;;  %v523_v42 = vsel %vm459_vm3, %v426_v36, %v491_v39 }
  0xdd   : > { %556 = vst.msk [vmem:[%s835_s13 + $0xf8] sm:$0xff] %vm524_vm1, %v523_v42 }
  0xde PF: > { %s13_s12 = sadd.s32 1, %s695_s12  }
  0xdf   : > { %p10_p4 = scmp.ge.s32.totalorder %s13_s12, 4  }
  0xe1   :  { %12 = sbr.rel (!%p10_p4) target bundleno = 1 (0x1), region = 62 }

// kernel: _lambda_.4
= control target key start
LH: loop header
LB: loop body
LE: loop exit
PB: predicated region body
PF: predicated region fallthrough
CT: control target
= control target key end

     0   :  { %vm163_vm0 = vcmask 130048   ;;  %s434_s1 = inlined_call_operand.vmem [shape: f32[128,16], index: 1, kind: input, shape index: {}]   ;;  %s435_s2 = inlined_call_operand.vmem [shape: f32[1,16], index: 2, kind: input, shape index: {}]   ;;  %s436_s0 = inlined_call_operand.vmem [shape: f32[128,128], index: 0, kind: input, shape index: {}]   ;;  %s437_s3 = inlined_call_operand.vmem [shape: f32[128,16], index: 3, kind: output, shape index: {}]  }
   0x1   :  { %v45_v0 = vld [vmem:[%s434_s1 + $0x78] sm:$0xff]  ;;  %v44_v1 = vld [vmem:[%s434_s1 + $0x70] sm:$0xff]  ;;  %v43_v2 = vld [vmem:[%s434_s1 + $0x68] sm:$0xff] }
   0x2   :  { %185 = vmatpush.msra.mxu2 %v45_v0  ;;  %186 = vmatpush.msra.mxu3 %v45_v0  ;;  %v42_v3 = vld [vmem:[%s434_s1 + $0x60] sm:$0xff]  ;;  %v41_v4 = vld [vmem:[%s434_s1 + $0x58] sm:$0xff]  ;;  %v40_v5 = vld [vmem:[%s434_s1 + $0x50] sm:$0xff] }
   0x3   :  { %50 = vmatpush.msra.mxu0 %v45_v0  ;;  %184 = vmatpush.msra.mxu1 %v45_v0  ;;  %v39_v6 = vld [vmem:[%s434_s1 + $0x48] sm:$0xff]  ;;  %v38_v7 = vld [vmem:[%s434_s1 + $0x40] sm:$0xff]  ;;  %v37_v8 = vld [vmem:[%s434_s1 + $0x38] sm:$0xff] }
   0x4   :  { %188 = vmatpush.msra.mxu2 %v44_v1  ;;  %189 = vmatpush.msra.mxu3 %v44_v1  ;;  %v36_v9 = vld [vmem:[%s434_s1 + $0x30] sm:$0xff]  ;;  %v35_v10 = vld [vmem:[%s434_s1 + $0x28] sm:$0xff]  ;;  %v34_v11 = vld [vmem:[%s434_s1 + $0x20] sm:$0xff] }
   0x5   :  { %51 = vmatpush.msra.mxu0 %v44_v1  ;;  %187 = vmatpush.msra.mxu1 %v44_v1  ;;  %v33_v12 = vld [vmem:[%s434_s1 + $0x18] sm:$0xff]  ;;  %v32_v13 = vld [vmem:[%s434_s1 + $0x10] sm:$0xff]  ;;  %v31_v14 = vld [vmem:[%s434_s1 + $0x8] sm:$0xff] }
   0x6   :  { %191 = vmatpush.msra.mxu2 %v43_v2  ;;  %192 = vmatpush.msra.mxu3 %v43_v2  ;;  %v30_v15 = vld [vmem:[%s434_s1] sm:$0xff]  ;;  %v23_v20 = vld [vmem:[%s436_s0 + $0x48] sm:$0xff]  ;;  %v24_v24 = vld [vmem:[%s436_s0 + $0x50] sm:$0xff] }
   0x7   :  { %52 = vmatpush.msra.mxu0 %v43_v2  ;;  %190 = vmatpush.msra.mxu1 %v43_v2  ;;  %v22_v16 = vld [vmem:[%s436_s0 + $0x40] sm:$0xff]  ;;  %v27_v21 = vld [vmem:[%s436_s0 + $0x68] sm:$0xff]  ;;  %v28_v25 = vld [vmem:[%s436_s0 + $0x70] sm:$0xff] }
   0x8   :  { %194 = vmatpush.msra.mxu2 %v42_v3  ;;  %195 = vmatpush.msra.mxu3 %v42_v3  ;;  %v26_v17 = vld [vmem:[%s436_s0 + $0x60] sm:$0xff]  ;;  %v15_v22 = vld [vmem:[%s436_s0 + $0x8] sm:$0xff]  ;;  %v16_v26 = vld [vmem:[%s436_s0 + $0x10] sm:$0xff] }
   0x9   :  { %53 = vmatpush.msra.mxu0 %v42_v3  ;;  %193 = vmatpush.msra.mxu1 %v42_v3  ;;  %v14_v18 = vld [vmem:[%s436_s0] sm:$0xff]  ;;  %v19_v23 = vld [vmem:[%s436_s0 + $0x28] sm:$0xff]  ;;  %v20_v27 = vld [vmem:[%s436_s0 + $0x30] sm:$0xff] }
   0xa   :  { %197 = vmatpush.msra.mxu2 %v41_v4  ;;  %198 = vmatpush.msra.mxu3 %v41_v4  ;;  %v18_v19 = vld [vmem:[%s436_s0 + $0x20] sm:$0xff]  ;;  %v25_v28 = vld [vmem:[%s436_s0 + $0x58] sm:$0xff] }
   0xb   :  { %54 = vmatpush.msra.mxu0 %v41_v4  ;;  %196 = vmatpush.msra.mxu1 %v41_v4  ;;  %v29_v29 = vld [vmem:[%s436_s0 + $0x78] sm:$0xff]  ;;  %v352_v32 = vld [vmem:[%s435_s2] ss:$0 sm:$0xff] }
   0xc   :  { %200 = vmatpush.msra.mxu2 %v40_v5  ;;  %201 = vmatpush.msra.mxu3 %v40_v5  ;;  %v17_v30 = vld [vmem:[%s436_s0 + $0x18] sm:$0xff] }
   0xd   :  { %55 = vmatpush.msra.mxu0 %v40_v5  ;;  %199 = vmatpush.msra.mxu1 %v40_v5  ;;  %v21_v31 = vld [vmem:[%s436_s0 + $0x38] sm:$0xff] }
   0xe   :  { %203 = vmatpush.msra.mxu2 %v39_v6  ;;  %204 = vmatpush.msra.mxu3 %v39_v6 }
   0xf   :  { %56 = vmatpush.msra.mxu0 %v39_v6  ;;  %202 = vmatpush.msra.mxu1 %v39_v6 }
  0x10   :  { %206 = vmatpush.msra.mxu2 %v38_v7  ;;  %207 = vmatpush.msra.mxu3 %v38_v7 }
  0x11   :  { %57 = vmatpush.msra.mxu0 %v38_v7  ;;  %205 = vmatpush.msra.mxu1 %v38_v7 }
  0x12   :  { %209 = vmatpush.msra.mxu2 %v37_v8  ;;  %210 = vmatpush.msra.mxu3 %v37_v8 }
  0x13   :  { %58 = vmatpush.msra.mxu0 %v37_v8  ;;  %208 = vmatpush.msra.mxu1 %v37_v8 }
  0x14   :  { %212 = vmatpush.msra.mxu2 %v36_v9  ;;  %213 = vmatpush.msra.mxu3 %v36_v9 }
  0x15   :  { %59 = vmatpush.msra.mxu0 %v36_v9  ;;  %211 = vmatpush.msra.mxu1 %v36_v9 }
  0x16   :  { %215 = vmatpush.msra.mxu2 %v35_v10  ;;  %216 = vmatpush.msra.mxu3 %v35_v10 }
  0x17   :  { %60 = vmatpush.msra.mxu0 %v35_v10  ;;  %214 = vmatpush.msra.mxu1 %v35_v10 }
  0x18   :  { %218 = vmatpush.msra.mxu2 %v34_v11  ;;  %219 = vmatpush.msra.mxu3 %v34_v11 }
  0x19   :  { %61 = vmatpush.msra.mxu0 %v34_v11  ;;  %217 = vmatpush.msra.mxu1 %v34_v11 }
  0x1a   :  { %221 = vmatpush.msra.mxu2 %v33_v12  ;;  %222 = vmatpush.msra.mxu3 %v33_v12 }
  0x1b   :  { %62 = vmatpush.msra.mxu0 %v33_v12  ;;  %220 = vmatpush.msra.mxu1 %v33_v12 }
  0x1c   :  { %224 = vmatpush.msra.mxu2 %v32_v13  ;;  %225 = vmatpush.msra.mxu3 %v32_v13 }
  0x1d   :  { %63 = vmatpush.msra.mxu0 %v32_v13  ;;  %223 = vmatpush.msra.mxu1 %v32_v13 }
  0x1e   :  { %227 = vmatpush.msra.mxu2 %v31_v14  ;;  %228 = vmatpush.msra.mxu3 %v31_v14 }
  0x1f   :  { %64 = vmatpush.msra.mxu0 %v31_v14  ;;  %226 = vmatpush.msra.mxu1 %v31_v14 }
  0x20   :  { %230 = vmatpush.msra.mxu2 %v30_v15  ;;  %231 = vmatpush.msra.mxu3 %v30_v15 }
  0x21   :  { %90 = vmatmul.f32.vlgmr.msra.gmra.mxu2 %v22_v16  ;;  %102 = vmatmul.f32.vlgmr.msra.gmra.mxu3 %v26_v17 }
  0x22   :  { %65 = vmatpush.msra.mxu0 %v30_v15  ;;  %229 = vmatpush.msra.mxu1 %v30_v15 }
  0x23   :  { %66 = vmatmul.f32.vlgmr.msra.gmra.mxu0 %v14_v18  ;;  %78 = vmatmul.f32.vlgmr.msra.gmra.mxu1 %v18_v19 }
  0x29   :  { %93 = vmatmul.f32.gmra.mxu2 %v23_v20  ;;  %105 = vmatmul.f32.gmra.mxu3 %v27_v21 }
  0x2b   :  { %69 = vmatmul.f32.gmra.mxu0 %v15_v22  ;;  %81 = vmatmul.f32.gmra.mxu1 %v19_v23 }
  0x31   :  { %96 = vmatmul.f32.gmra.mxu2 %v24_v24  ;;  %108 = vmatmul.f32.gmra.mxu3 %v28_v25 }
  0x33   :  { %72 = vmatmul.f32.gmra.mxu0 %v16_v26  ;;  %84 = vmatmul.f32.gmra.mxu1 %v20_v27 }
  0x39   :  { %99 = vmatmul.f32.gmra.mxu2 %v25_v28  ;;  %111 = vmatmul.f32.gmra.mxu3 %v29_v29 }
  0x3b   :  { %75 = vmatmul.f32.gmra.mxu0 %v17_v30  ;;  %87 = vmatmul.f32.gmra.mxu1 %v21_v31 }
  0xa0   :  { %v67_v33 = vpop.f32.mrf.mxu0  ;;  %v79_v34 = vpop.f32.mrf.mxu1 }
  0xa1   :  { %v68_v35 = vadd.f32 %v352_v32, %v67_v33  ;;  %v80_v36 = vadd.f32 %v352_v32, %v79_v34 }
  0xa3   :  { %vm115_vm1 = vcmp.gt.f32.partialorder %v68_v35, 0.0  ;;  %v131_v37 = vmul.f32 0.2, %v68_v35  ;;  %vm119_vm2 = vcmp.gt.f32.partialorder %v80_v36, 0.0  ;;  %v135_v38 = vmul.f32 0.2, %v80_v36 }
  0xa4   :  { %v91_v39 = vpop.f32.mrf.mxu2  ;;  %v103_v40 = vpop.f32.mrf.mxu3 }
  0xa5   :  { %v147_v41 = vsel %vm115_vm1, %v68_v35, %v131_v37  ;;  %v151_v42 = vsel %vm119_vm2, %v80_v36, %v135_v38  ;;  %v92_v43 = vadd.f32 %v352_v32, %v91_v39  ;;  %v104_v44 = vadd.f32 %v352_v32, %v103_v40 }
  0xa6   :  { %164 = vst.msk [vmem:[%s437_s3] sm:$0xff] %vm163_vm0, %v147_v41 }
  0xa7   :  { %168 = vst.msk [vmem:[%s437_s3 + $0x20] sm:$0xff] %vm163_vm0, %v151_v42  ;;  %vm123_vm3 = vcmp.gt.f32.partialorder %v92_v43, 0.0  ;;  %v139_v45 = vmul.f32 0.2, %v92_v43  ;;  %vm127_vm4 = vcmp.gt.f32.partialorder %v104_v44, 0.0 }
  0xa8   :  { %v143_v46 = vmul.f32 0.2, %v104_v44  ;;  %v70_v47 = vpop.f32.mrf.mxu0  ;;  %v82_v48 = vpop.f32.mrf.mxu1 }
  0xa9   :  { %v155_v49 = vsel %vm123_vm3, %v92_v43, %v139_v45  ;;  %v71_v50 = vadd.f32 %v352_v32, %v70_v47  ;;  %v83_v51 = vadd.f32 %v352_v32, %v82_v48 }
  0xaa   :  { %172 = vst.msk [vmem:[%s437_s3 + $0x40] sm:$0xff] %vm163_vm0, %v155_v49  ;;  %v159_v52 = vsel %vm127_vm4, %v104_v44, %v143_v46 }
  0xab   :  { %176 = vst.msk [vmem:[%s437_s3 + $0x60] sm:$0xff] %vm163_vm0, %v159_v52  ;;  %vm116_vm5 = vcmp.gt.f32.partialorder %v71_v50, 0.0  ;;  %v132_v53 = vmul.f32 0.2, %v71_v50  ;;  %vm120_vm6 = vcmp.gt.f32.partialorder %v83_v51, 0.0 }
  0xac   :  { %v136_v54 = vmul.f32 0.2, %v83_v51  ;;  %v94_v55 = vpop.f32.mrf.mxu2  ;;  %v106_v56 = vpop.f32.mrf.mxu3 }
  0xad   :  { %v148_v57 = vsel %vm116_vm5, %v71_v50, %v132_v53  ;;  %v95_v58 = vadd.f32 %v352_v32, %v94_v55  ;;  %v107_v59 = vadd.f32 %v352_v32, %v106_v56 }
  0xae   :  { %165 = vst.msk [vmem:[%s437_s3 + $0x8] sm:$0xff] %vm163_vm0, %v148_v57  ;;  %v152_v60 = vsel %vm120_vm6, %v83_v51, %v136_v54 }
  0xaf   :  { %169 = vst.msk [vmem:[%s437_s3 + $0x28] sm:$0xff] %vm163_vm0, %v152_v60  ;;  %vm124_vm7 = vcmp.gt.f32.partialorder %v95_v58, 0.0  ;;  %v140_v61 = vmul.f32 0.2, %v95_v58  ;;  %vm128_vm8 = vcmp.gt.f32.partialorder %v107_v59, 0.0 }
  0xb0   :  { %v144_v62 = vmul.f32 0.2, %v107_v59  ;;  %v73_v63 = vpop.f32.mrf.mxu0  ;;  %v85_v0 = vpop.f32.mrf.mxu1 }
  0xb1   :  { %v156_v1 = vsel %vm124_vm7, %v95_v58, %v140_v61  ;;  %v74_v2 = vadd.f32 %v352_v32, %v73_v63  ;;  %v86_v3 = vadd.f32 %v352_v32, %v85_v0 }
  0xb2   :  { %173 = vst.msk [vmem:[%s437_s3 + $0x48] sm:$0xff] %vm163_vm0, %v156_v1  ;;  %v160_v4 = vsel %vm128_vm8, %v107_v59, %v144_v62 }
  0xb3   :  { %177 = vst.msk [vmem:[%s437_s3 + $0x68] sm:$0xff] %vm163_vm0, %v160_v4  ;;  %vm117_vm9 = vcmp.gt.f32.partialorder %v74_v2, 0.0  ;;  %v133_v5 = vmul.f32 0.2, %v74_v2  ;;  %vm121_vm10 = vcmp.gt.f32.partialorder %v86_v3, 0.0 }
  0xb4   :  { %v137_v6 = vmul.f32 0.2, %v86_v3  ;;  %v97_v7 = vpop.f32.mrf.mxu2  ;;  %v109_v8 = vpop.f32.mrf.mxu3 }
  0xb5   :  { %v149_v9 = vsel %vm117_vm9, %v74_v2, %v133_v5  ;;  %v98_v10 = vadd.f32 %v352_v32, %v97_v7  ;;  %v110_v11 = vadd.f32 %v352_v32, %v109_v8 }
  0xb6   :  { %166 = vst.msk [vmem:[%s437_s3 + $0x10] sm:$0xff] %vm163_vm0, %v149_v9  ;;  %v153_v12 = vsel %vm121_vm10, %v86_v3, %v137_v6 }
  0xb7   :  { %170 = vst.msk [vmem:[%s437_s3 + $0x30] sm:$0xff] %vm163_vm0, %v153_v12  ;;  %vm125_vm11 = vcmp.gt.f32.partialorder %v98_v10, 0.0  ;;  %v141_v13 = vmul.f32 0.2, %v98_v10  ;;  %vm129_vm12 = vcmp.gt.f32.partialorder %v110_v11, 0.0 }
  0xb8   :  { %v145_v14 = vmul.f32 0.2, %v110_v11  ;;  %v76_v15 = vpop.f32.mrf.mxu0  ;;  %v88_v16 = vpop.f32.mrf.mxu1 }
  0xb9   :  { %v157_v17 = vsel %vm125_vm11, %v98_v10, %v141_v13  ;;  %v77_v18 = vadd.f32 %v352_v32, %v76_v15  ;;  %v89_v19 = vadd.f32 %v352_v32, %v88_v16 }
  0xba   :  { %174 = vst.msk [vmem:[%s437_s3 + $0x50] sm:$0xff] %vm163_vm0, %v157_v17  ;;  %v161_v20 = vsel %vm129_vm12, %v110_v11, %v145_v14 }
  0xbb   :  { %178 = vst.msk [vmem:[%s437_s3 + $0x70] sm:$0xff] %vm163_vm0, %v161_v20  ;;  %vm118_vm13 = vcmp.gt.f32.partialorder %v77_v18, 0.0  ;;  %v134_v21 = vmul.f32 0.2, %v77_v18  ;;  %vm122_vm14 = vcmp.gt.f32.partialorder %v89_v19, 0.0 }
  0xbc   :  { %v138_v22 = vmul.f32 0.2, %v89_v19  ;;  %v100_v23 = vpop.f32.mrf.mxu2  ;;  %v112_v24 = vpop.f32.mrf.mxu3 }
  0xbd   :  { %v150_v25 = vsel %vm118_vm13, %v77_v18, %v134_v21  ;;  %v101_v26 = vadd.f32 %v352_v32, %v100_v23  ;;  %v113_v27 = vadd.f32 %v352_v32, %v112_v24 }
  0xbe   :  { %167 = vst.msk [vmem:[%s437_s3 + $0x18] sm:$0xff] %vm163_vm0, %v150_v25  ;;  %v154_v28 = vsel %vm122_vm14, %v89_v19, %v138_v22 }
  0xbf   :  { %171 = vst.msk [vmem:[%s437_s3 + $0x38] sm:$0xff] %vm163_vm0, %v154_v28  ;;  %vm126_vm15 = vcmp.gt.f32.partialorder %v101_v26, 0.0  ;;  %v142_v29 = vmul.f32 0.2, %v101_v26  ;;  %vm130_vm1 = vcmp.gt.f32.partialorder %v113_v27, 0.0 }
  0xc0   :  { %v146_v30 = vmul.f32 0.2, %v113_v27 }
  0xc1   :  { %v158_v31 = vsel %vm126_vm15, %v101_v26, %v142_v29 }
  0xc2   :  { %175 = vst.msk [vmem:[%s437_s3 + $0x58] sm:$0xff] %vm163_vm0, %v158_v31  ;;  %v162_v32 = vsel %vm130_vm1, %v113_v27, %v146_v30 }
  0xc3   :  { %179 = vst.msk [vmem:[%s437_s3 + $0x78] sm:$0xff] %vm163_vm0, %v162_v32 }

// kernel: _lambda_.5
= control target key start
LH: loop header
LB: loop body
LE: loop exit
PB: predicated region body
PF: predicated region fallthrough
CT: control target
= control target key end

     0   :  { %s324_s1 = inlined_call_operand.vmem [shape: f32[256,128], index: 1, kind: input, shape index: {}]   ;;  %s325_s2 = inlined_call_operand.vmem [shape: f32[1,128], index: 2, kind: input, shape index: {}]   ;;  %s326_s0 = inlined_call_operand.vmem [shape: f32[32,256], index: 0, kind: input, shape index: {}]   ;;  %s327_s3 = inlined_call_operand.vmem [shape: f32[32,128], index: 3, kind: output, shape index: {}]  }
   0x1   :  { %v37_v0 = vld [vmem:[%s324_s1 + $0x78] sm:$0xff]  ;;  %v36_v1 = vld [vmem:[%s324_s1 + $0x70] sm:$0xff]  ;;  %v35_v4 = vld [vmem:[%s324_s1 + $0x68] sm:$0xff] }
   0x2   :  { %v53_v2 = vld [vmem:[%s324_s1 + $0xf8] sm:$0xff]  ;;  %136 = vmatpush.msra.mxu2 %v37_v0  ;;  %v52_v3 = vld [vmem:[%s324_s1 + $0xf0] sm:$0xff]  ;;  %58 = vmatpush.msra.mxu0 %v37_v0  ;;  %v51_v5 = vld [vmem:[%s324_s1 + $0xe8] sm:$0xff] }
   0x3   :  { %152 = vmatpush.msra.mxu3 %v53_v2  ;;  %87 = vmatpush.msra.mxu1 %v53_v2  ;;  %v34_v6 = vld [vmem:[%s324_s1 + $0x60] sm:$0xff]  ;;  %v33_v8 = vld [vmem:[%s324_s1 + $0x58] sm:$0xff]  ;;  %v32_v10 = vld [vmem:[%s324_s1 + $0x50] sm:$0xff] }
   0x4   :  { %137 = vmatpush.msra.mxu2 %v36_v1  ;;  %59 = vmatpush.msra.mxu0 %v36_v1  ;;  %v50_v7 = vld [vmem:[%s324_s1 + $0xe0] sm:$0xff]  ;;  %v49_v9 = vld [vmem:[%s324_s1 + $0xd8] sm:$0xff]  ;;  %v48_v11 = vld [vmem:[%s324_s1 + $0xd0] sm:$0xff] }
   0x5   :  { %153 = vmatpush.msra.mxu3 %v52_v3  ;;  %88 = vmatpush.msra.mxu1 %v52_v3  ;;  %v31_v12 = vld [vmem:[%s324_s1 + $0x48] sm:$0xff]  ;;  %v30_v14 = vld [vmem:[%s324_s1 + $0x40] sm:$0xff]  ;;  %v29_v16 = vld [vmem:[%s324_s1 + $0x38] sm:$0xff] }
   0x6   :  { %138 = vmatpush.msra.mxu2 %v35_v4  ;;  %60 = vmatpush.msra.mxu0 %v35_v4  ;;  %v47_v13 = vld [vmem:[%s324_s1 + $0xc8] sm:$0xff]  ;;  %v46_v15 = vld [vmem:[%s324_s1 + $0xc0] sm:$0xff]  ;;  %v45_v17 = vld [vmem:[%s324_s1 + $0xb8] sm:$0xff] }
   0x7   :  { %154 = vmatpush.msra.mxu3 %v51_v5  ;;  %89 = vmatpush.msra.mxu1 %v51_v5  ;;  %v28_v18 = vld [vmem:[%s324_s1 + $0x30] sm:$0xff]  ;;  %v27_v20 = vld [vmem:[%s324_s1 + $0x28] sm:$0xff]  ;;  %v26_v22 = vld [vmem:[%s324_s1 + $0x20] sm:$0xff] }
   0x8   :  { %139 = vmatpush.msra.mxu2 %v34_v6  ;;  %61 = vmatpush.msra.mxu0 %v34_v6  ;;  %v44_v19 = vld [vmem:[%s324_s1 + $0xb0] sm:$0xff]  ;;  %v43_v21 = vld [vmem:[%s324_s1 + $0xa8] sm:$0xff]  ;;  %v42_v23 = vld [vmem:[%s324_s1 + $0xa0] sm:$0xff] }
   0x9   :  { %155 = vmatpush.msra.mxu3 %v50_v7  ;;  %90 = vmatpush.msra.mxu1 %v50_v7  ;;  %v25_v24 = vld [vmem:[%s324_s1 + $0x18] sm:$0xff]  ;;  %v24_v26 = vld [vmem:[%s324_s1 + $0x10] sm:$0xff]  ;;  %v23_v28 = vld [vmem:[%s324_s1 + $0x8] sm:$0xff] }
   0xa   :  { %140 = vmatpush.msra.mxu2 %v33_v8  ;;  %62 = vmatpush.msra.mxu0 %v33_v8  ;;  %v41_v25 = vld [vmem:[%s324_s1 + $0x98] sm:$0xff]  ;;  %v40_v27 = vld [vmem:[%s324_s1 + $0x90] sm:$0xff]  ;;  %v39_v29 = vld [vmem:[%s324_s1 + $0x88] sm:$0xff] }
   0xb   :  { %156 = vmatpush.msra.mxu3 %v49_v9  ;;  %91 = vmatpush.msra.mxu1 %v49_v9  ;;  %v22_v30 = vld [vmem:[%s324_s1] sm:$0xff]  ;;  %v19_v33 = vld [vmem:[%s326_s0 + $0x28] sm:$0xff]  ;;  %v20_v36 = vld [vmem:[%s326_s0 + $0x30] sm:$0xff] }
   0xc   :  { %141 = vmatpush.msra.mxu2 %v32_v10  ;;  %63 = vmatpush.msra.mxu0 %v32_v10  ;;  %v38_v31 = vld [vmem:[%s324_s1 + $0x80] sm:$0xff]  ;;  %v15_v35 = vld [vmem:[%s326_s0 + $0x8] sm:$0xff]  ;;  %v21_v37 = vld [vmem:[%s326_s0 + $0x38] sm:$0xff] }
   0xd   :  { %157 = vmatpush.msra.mxu3 %v48_v11  ;;  %92 = vmatpush.msra.mxu1 %v48_v11  ;;  %v18_v32 = vld [vmem:[%s326_s0 + $0x20] sm:$0xff]  ;;  %v16_v38 = vld [vmem:[%s326_s0 + $0x10] sm:$0xff]  ;;  %v17_v39 = vld [vmem:[%s326_s0 + $0x18] sm:$0xff] }
   0xe   :  { %142 = vmatpush.msra.mxu2 %v31_v12  ;;  %64 = vmatpush.msra.mxu0 %v31_v12  ;;  %v14_v34 = vld [vmem:[%s326_s0] sm:$0xff] }
   0xf   :  { %158 = vmatpush.msra.mxu3 %v47_v13  ;;  %93 = vmatpush.msra.mxu1 %v47_v13  ;;  %v168_v40 = vld [vmem:[%s325_s2] ss:$0 sm:$0xff] }
  0x10   :  { %143 = vmatpush.msra.mxu2 %v30_v14  ;;  %65 = vmatpush.msra.mxu0 %v30_v14 }
  0x11   :  { %159 = vmatpush.msra.mxu3 %v46_v15  ;;  %94 = vmatpush.msra.mxu1 %v46_v15 }
  0x12   :  { %144 = vmatpush.msra.mxu2 %v29_v16  ;;  %66 = vmatpush.msra.mxu0 %v29_v16 }
  0x13   :  { %160 = vmatpush.msra.mxu3 %v45_v17  ;;  %95 = vmatpush.msra.mxu1 %v45_v17 }
  0x14   :  { %145 = vmatpush.msra.mxu2 %v28_v18  ;;  %67 = vmatpush.msra.mxu0 %v28_v18 }
  0x15   :  { %161 = vmatpush.msra.mxu3 %v44_v19  ;;  %96 = vmatpush.msra.mxu1 %v44_v19 }
  0x16   :  { %146 = vmatpush.msra.mxu2 %v27_v20  ;;  %68 = vmatpush.msra.mxu0 %v27_v20 }
  0x17   :  { %162 = vmatpush.msra.mxu3 %v43_v21  ;;  %97 = vmatpush.msra.mxu1 %v43_v21 }
  0x18   :  { %147 = vmatpush.msra.mxu2 %v26_v22  ;;  %69 = vmatpush.msra.mxu0 %v26_v22 }
  0x19   :  { %163 = vmatpush.msra.mxu3 %v42_v23  ;;  %98 = vmatpush.msra.mxu1 %v42_v23 }
  0x1a   :  { %148 = vmatpush.msra.mxu2 %v25_v24  ;;  %70 = vmatpush.msra.mxu0 %v25_v24 }
  0x1b   :  { %164 = vmatpush.msra.mxu3 %v41_v25  ;;  %99 = vmatpush.msra.mxu1 %v41_v25 }
  0x1c   :  { %149 = vmatpush.msra.mxu2 %v24_v26  ;;  %71 = vmatpush.msra.mxu0 %v24_v26 }
  0x1d   :  { %165 = vmatpush.msra.mxu3 %v40_v27  ;;  %100 = vmatpush.msra.mxu1 %v40_v27 }
  0x1e   :  { %150 = vmatpush.msra.mxu2 %v23_v28  ;;  %72 = vmatpush.msra.mxu0 %v23_v28 }
  0x1f   :  { %166 = vmatpush.msra.mxu3 %v39_v29  ;;  %101 = vmatpush.msra.mxu1 %v39_v29 }
  0x20   :  { %151 = vmatpush.msra.mxu2 %v22_v30  ;;  %73 = vmatpush.msra.mxu0 %v22_v30 }
  0x21   :  { %167 = vmatpush.msra.mxu3 %v38_v31  ;;  %80 = vmatmul.f32.vlgmr.msra.gmra.mxu2 %v18_v32 }
  0x22   :  { %109 = vmatmul.f32.vlgmr.msra.gmra.mxu3 %v19_v33  ;;  %102 = vmatpush.msra.mxu1 %v38_v31 }
  0x23   :  { %74 = vmatmul.f32.vlgmr.msra.gmra.mxu0 %v14_v34  ;;  %103 = vmatmul.f32.vlgmr.msra.gmra.mxu1 %v15_v35 }
  0x29   :  { %83 = vmatmul.f32.gmra.mxu2 %v20_v36 }
  0x2a   :  { %112 = vmatmul.f32.gmra.mxu3 %v21_v37 }
  0x2b   :  { %77 = vmatmul.f32.gmra.mxu0 %v16_v38  ;;  %106 = vmatmul.f32.gmra.mxu1 %v17_v39 }
  0xa0   :  { %v75_v41 = vpop.f32.mrf.mxu0  ;;  %v104_v42 = vpop.f32.mrf.mxu1 }
  0xa1   :  { %v76_v43 = vadd.f32 %v168_v40, %v75_v41 }
  0xa3   :  { %v105_v44 = vadd.f32 %v104_v42, %v76_v43 }
  0xa4   :  { %v81_v45 = vpop.f32.mrf.mxu2 }
  0xa5   :  { %v110_v46 = vpop.f32.mrf.mxu3  ;;  %v82_v47 = vadd.f32 %v168_v40, %v81_v45  ;;  %vm116_vm0 = vcmp.gt.f32.partialorder %v105_v44, 0.0  ;;  %v120_v48 = vmul.f32 0.2, %v105_v44 }
  0xa7   :  { %v124_v49 = vsel %vm116_vm0, %v105_v44, %v120_v48  ;;  %v111_v50 = vadd.f32 %v110_v46, %v82_v47 }
  0xa8   :  { %128 = vst [vmem:[%s327_s3] sm:$0xff] %v124_v49  ;;  %v78_v51 = vpop.f32.mrf.mxu0  ;;  %v107_v52 = vpop.f32.mrf.mxu1 }
  0xa9   :  { %vm118_vm1 = vcmp.gt.f32.partialorder %v111_v50, 0.0  ;;  %v122_v53 = vmul.f32 0.2, %v111_v50  ;;  %v79_v54 = vadd.f32 %v168_v40, %v78_v51 }
  0xab   :  { %v126_v55 = vsel %vm118_vm1, %v111_v50, %v122_v53  ;;  %v108_v56 = vadd.f32 %v107_v52, %v79_v54 }
  0xac   :  { %130 = vst [vmem:[%s327_s3 + $0x10] sm:$0xff] %v126_v55  ;;  %v84_v57 = vpop.f32.mrf.mxu2 }
  0xad   :  { %v113_v58 = vpop.f32.mrf.mxu3  ;;  %v85_v59 = vadd.f32 %v168_v40, %v84_v57  ;;  %vm117_vm2 = vcmp.gt.f32.partialorder %v108_v56, 0.0  ;;  %v121_v60 = vmul.f32 0.2, %v108_v56 }
  0xaf   :  { %v125_v61 = vsel %vm117_vm2, %v108_v56, %v121_v60  ;;  %v114_v62 = vadd.f32 %v113_v58, %v85_v59 }
  0xb0   :  { %129 = vst [vmem:[%s327_s3 + $0x8] sm:$0xff] %v125_v61 }
  0xb1   :  { %vm119_vm3 = vcmp.gt.f32.partialorder %v114_v62, 0.0  ;;  %v123_v63 = vmul.f32 0.2, %v114_v62 }
  0xb3   :  { %v127_v0 = vsel %vm119_vm3, %v114_v62, %v123_v63 }
  0xb4   :  { %131 = vst [vmem:[%s327_s3 + $0x18] sm:$0xff] %v127_v0 }

</bundles_post_ra>
